<compile_context>
chip_gen: v5e
topology: v5e:2x2
jax: 0.10.0
libtpu: 0.0.40
codegen_flags: <defaults>
</compile_context>

<pallas_src>
import functools

import jax
import jax.numpy as jnp
from jax import lax
from jax.experimental import pallas as pl
from jax.experimental.pallas import tpu as pltpu


# ----------------------------------------------------------------------------
# Fused kernel: one grid step = `bblk` batch elements.
#   qkv  = [x0;x1;...] @ Wqkv                      (tall bf16 MXU matmul)
#   per-head causal softmax attention -> scratch   (unrolled over H heads)
#   out  = scratch @ Wproj + b                     (tall bf16 MXU matmul)
# ----------------------------------------------------------------------------
def _mha_kernel(x_ref, wqkv_ref, wproj_ref, b_ref, o_ref, att_ref, *,
                num_heads, head_size):
    bblk, T, C = x_ref.shape
    hhs = num_heads * head_size
    rows = bblk * T

    # Fused QKV projection as one wide (bblk*T, C) @ (C, 3*H*hs) bf16 matmul.
    x2 = x_ref[...].reshape(rows, C)                                   # bf16
    qkv = jnp.dot(x2, wqkv_ref[...],
                  preferred_element_type=jnp.float32)                  # (rows, 3*hhs) f32
    qkv = qkv.reshape(bblk, T, 3 * hhs)

    # Causal mask, shared across batch and heads.  Diagonal is always kept, so
    # the row max stays finite and s - max never produces NaNs.
    r = lax.broadcasted_iota(jnp.int32, (T, T), 0)
    c = lax.broadcasted_iota(jnp.int32, (T, T), 1)
    causal = r >= c                                                    # (T, T)

    for h in range(num_heads):            # H is small; scratch writes bound live ranges
        lo = h * head_size
        hi = lo + head_size
        q = qkv[:, :, lo:hi].astype(jnp.bfloat16)                      # scale folded into Wqkv
        k = qkv[:, :, hhs + lo:hhs + hi].astype(jnp.bfloat16)
        v = qkv[:, :, 2 * hhs + lo:2 * hhs + hi].astype(jnp.bfloat16)

        # scores = q @ k^T, contracting hs (no explicit transpose -> no XLU push).
        s = jnp.einsum('btd,bsd->bts', q, k,
                       preferred_element_type=jnp.float32)             # (bblk, T, T)
        s = jnp.where(causal, s, -jnp.inf)
        s = s - jnp.max(s, axis=-1, keepdims=True)
        p = jnp.exp(s)
        # EUP reciprocal (approx) -- fine for eval; use exact divide for training/bwd.
        p = p * pl.reciprocal(jnp.sum(p, axis=-1, keepdims=True), approx=True)
        ov = jnp.einsum('bts,bsd->btd', p.astype(jnp.bfloat16), v,
                        preferred_element_type=jnp.float32)            # (bblk, T, hs)
        att_ref[:, :, lo:hi] = ov.astype(att_ref.dtype)                # write into scratch slice

    # Output projection + bias, again as one tall bf16 MXU matmul from scratch.
    att = att_ref[...].reshape(rows, hhs)                              # bf16
    out = jnp.dot(att, wproj_ref[...], preferred_element_type=jnp.float32)  # (rows, C) f32
    out = out + b_ref[...]                                             # (1, C) f32 bias broadcast
    o_ref[...] = out.reshape(bblk, T, C)


def _pick_batch_block(B, T, target_rows=256):
    """Batch enough sequences per grid step that the projection M-dim ~ target_rows."""
    bblk = max(1, min(B, max(1, target_rows // max(T, 1))))
    while B % bblk:
        bblk -= 1
    return bblk


def _vmem_limit_bytes(bblk, T, C, hhs):
    """Per-step VMEM footprint estimate (bf16 inputs, f32 accum), with headroom."""
    bf, f4 = 2, 4
    est = (
        2 * bblk * T * C * bf                                  # x block (double-buffered)
        + 2 * bblk * T * C * f4                                # out block (double-buffered)
        + 2 * (C * 3 * hhs + hhs * C) * bf + 2 * C * f4        # weights + bias (default 2x)
        + bblk * T * 3 * hhs * f4                              # qkv intermediate
        + 4 * bblk * T * T * f4                                # scores / exp temporaries
        + bblk * T * hhs * bf                                  # head-output scratch
    )
    return int(min(max(2 * est, 8 * 1024 * 1024), 64 * 1024 * 1024))


@functools.partial(jax.jit, static_argnames=("num_heads", "head_size"))
def multihead_forward(x, wqkv, w_proj, b_proj, *, num_heads, head_size):
    """Fused multi-head causal self-attention (eval mode).

    x      : (B, T, C) float32
    wqkv   : (C, 3*H*hs)  -- columns are [Q heads | K heads | V heads],
             with 1/sqrt(hs) already folded into the Q columns.
    w_proj : (H*hs, C)
    b_proj : (C,)
    """
    B, T, C = x.shape
    hhs = num_heads * head_size
    bblk = _pick_batch_block(B, T)

    # bf16 MXU inputs; accumulation stays f32 inside the kernel.
    x_bf = x.astype(jnp.bfloat16)
    wqkv_bf = wqkv.astype(jnp.bfloat16)
    wproj_bf = w_proj.astype(jnp.bfloat16)
    bias = b_proj.reshape(1, C).astype(jnp.float32)

    kernel = functools.partial(_mha_kernel, num_heads=num_heads, head_size=head_size)

    return pl.pallas_call(
        kernel,
        out_shape=jax.ShapeDtypeStruct((B, T, C), jnp.float32),
        grid_spec=pltpu.PrefetchScalarGridSpec(
            num_scalar_prefetch=0,
            grid=(B // bblk,),
            in_specs=[
                pl.BlockSpec((bblk, T, C), lambda b: (b, 0, 0)),       # x block (bf16)
                pl.BlockSpec((C, 3 * hhs), lambda b: (0, 0)),          # Wqkv (grid-invariant)
                pl.BlockSpec((hhs, C), lambda b: (0, 0)),              # Wproj (grid-invariant)
                pl.BlockSpec((1, C), lambda b: (0, 0)),                # bias
            ],
            out_specs=pl.BlockSpec((bblk, T, C), lambda b: (b, 0, 0)),  # wide f32 slab write
            scratch_shapes=[pltpu.VMEM((bblk, T, hhs), jnp.bfloat16)],  # head-output accumulator
        ),
        compiler_params=pltpu.CompilerParams(
            dimension_semantics=("parallel",),                          # batch blocks shard across TCs
            vmem_limit_bytes=_vmem_limit_bytes(bblk, T, C, hhs),
        ),
    )(x_bf, wqkv_bf, wproj_bf, bias)


def _stack_qkv(wq, wk, wv, head_size):
    """Per-head (H, C, hs) Q/K/V weights -> fused (C, 3*H*hs) matrix.

    The 1/sqrt(head_size) attention scale is folded into the Q columns so the
    kernel never multiplies q (or the (T,T) logits) by the scale.
    """
    H, C, hs = wq.shape
    to_cols = lambda w: jnp.transpose(w, (1, 0, 2)).reshape(C, H * hs)
    scale = jnp.float32(head_size) ** -0.5
    return jnp.concatenate([to_cols(wq) * scale, to_cols(wk), to_cols(wv)], axis=-1)


def _reference(x, wq, wk, wv, w_proj, b_proj):
    """Pure-JAX f32 reference mirroring the PyTorch forward (eval mode)."""
    B, T, C = x.shape
    H, _, hs = wq.shape
    outs = []
    for h in range(H):
        q = x @ wq[h]
        k = x @ wk[h]
        v = x @ wv[h]
        wei = (q @ jnp.swapaxes(k, -2, -1)) * (hs ** -0.5)
        mask = jnp.tril(jnp.ones((T, T), jnp.bool_))
        wei = jnp.where(mask, wei, -jnp.inf)
        wei = jax.nn.softmax(wei, axis=-1)
        outs.append(wei @ v)
    cat = jnp.concatenate(outs, axis=-1)
    return cat @ w_proj + b_proj


if __name__ == "__main__":
    # Small shapes consistent with the module: block_size (=T) 8, n_embd 32,
    # num_heads 4, head_size 8.
    B, T, C = 2, 8, 32
    H, hs = 4, 8

    key = jax.random.PRNGKey(0)
    kx, kq, kk, kv, kp, kb = jax.random.split(key, 6)

    x = jax.random.normal(kx, (B, T, C), jnp.float32)
    wq = jax.random.normal(kq, (H, C, hs), jnp.float32) * 0.1
    wk = jax.random.normal(kk, (H, C, hs), jnp.float32) * 0.1
    wv = jax.random.normal(kv, (H, C, hs), jnp.float32) * 0.1
    w_proj = jax.random.normal(kp, (H * hs, C), jnp.float32) * 0.1
    b_proj = jax.random.normal(kb, (C,), jnp.float32) * 0.1

    # One-time weight re-layout + scale folding (done at model load time in practice).
    wqkv = _stack_qkv(wq, wk, wv, hs)

    out = multihead_forward(x, wqkv, w_proj, b_proj, num_heads=H, head_size=hs)
    out = jax.block_until_ready(out)

    ref = _reference(x, wq, wk, wv, w_proj, b_proj)
    assert out.shape == (B, T, C)
    # bf16 MXU inputs (with f32 accumulation) -> ~1e-2-level agreement vs the f32 reference.
    assert jnp.allclose(out, ref, atol=3e-2, rtol=3e-2), "mismatch vs reference"

    print("KERNEL_OK")
</pallas_src>

<mosaic_0001>
module attributes {stable_mosaic.version = 11 : i64} {
  func.func @_mha_kernel(%arg0: i32, %arg1: memref<2x8x32xbf16, #tpu.memory_space<vmem>>, %arg2: memref<32x96xbf16, #tpu.memory_space<vmem>>, %arg3: memref<32x32xbf16, #tpu.memory_space<vmem>>, %arg4: memref<1x32xf32, #tpu.memory_space<vmem>>, %arg5: memref<2x8x32xf32, #tpu.memory_space<vmem>>, %arg6: memref<2x8x32xbf16, #tpu.memory_space<vmem>>) attributes {dimension_semantics = [#tpu.dimension_semantics<parallel>], iteration_bounds = array<i64: 1>, scalar_prefetch = 0 : i64, scratch_operands = 1 : i64, tpu.core_type = #tpu.core_type<tc>, window_params = [{transform_indices = @transform_0, window_bounds = array<i64: 2, 8, 32>}, {pipeline_mode = #tpu.pipeline_mode<synchronous>, transform_indices = @transform_1, window_bounds = array<i64: 32, 96>}, {pipeline_mode = #tpu.pipeline_mode<synchronous>, transform_indices = @transform_2, window_bounds = array<i64: 32, 32>}, {pipeline_mode = #tpu.pipeline_mode<synchronous>, transform_indices = @transform_3, window_bounds = array<i64: 1, 32>}, {transform_indices = @transform_4, window_bounds = array<i64: 2, 8, 32>}]} {
    %c0 = arith.constant 0 : index
    %c0_0 = arith.constant 0 : index
    %c0_1 = arith.constant 0 : index
    %0 = vector.load %arg1[%c0, %c0_0, %c0_1] : memref<2x8x32xbf16, #tpu.memory_space<vmem>>, vector<2x8x32xbf16>
    %1 = vector.shape_cast %0 : vector<2x8x32xbf16> to vector<16x32xbf16>
    %c0_2 = arith.constant 0 : index
    %c0_3 = arith.constant 0 : index
    %2 = vector.load %arg2[%c0_2, %c0_3] : memref<32x96xbf16, #tpu.memory_space<vmem>>, vector<32x96xbf16>
    %cst = arith.constant dense<0.000000e+00> : vector<16x96xf32>
    %3 = tpu.matmul %1, %2, %cst {dimension_numbers = #tpu.dot_dimension_numbers<[1], [0], [0], [1], [0, 0, 1, 1], [], []>} : vector<16x32xbf16>, vector<32x96xbf16>, vector<16x96xf32> -> vector<16x96xf32>
    %4 = vector.shape_cast %3 : vector<16x96xf32> to vector<2x8x96xf32>
    %5 = tpu.iota {dimensions = array<i32: 0>} : vector<8x8xi32>
    %6 = tpu.iota {dimensions = array<i32: 1>} : vector<8x8xi32>
    %7 = arith.cmpi sge, %5, %6 : vector<8x8xi32>
    %8 = vector.extract_strided_slice %4 {offsets = [0, 0, 0], sizes = [2, 8, 8], strides = [1, 1, 1]} : vector<2x8x96xf32> to vector<2x8x8xf32>
    %9 = arith.truncf %8 : vector<2x8x8xf32> to vector<2x8x8xbf16>
    %10 = vector.extract_strided_slice %4 {offsets = [0, 0, 32], sizes = [2, 8, 8], strides = [1, 1, 1]} : vector<2x8x96xf32> to vector<2x8x8xf32>
    %11 = arith.truncf %10 : vector<2x8x8xf32> to vector<2x8x8xbf16>
    %12 = vector.extract_strided_slice %4 {offsets = [0, 0, 64], sizes = [2, 8, 8], strides = [1, 1, 1]} : vector<2x8x96xf32> to vector<2x8x8xf32>
    %13 = arith.truncf %12 : vector<2x8x8xf32> to vector<2x8x8xbf16>
    "tpu.trace_start"() <{level = 10 : i32, message = "btd,bsd->bts"}> : () -> ()
    %cst_4 = arith.constant dense<0.000000e+00> : vector<2x8x8xf32>
    %14 = tpu.matmul %9, %11, %cst_4 {dimension_numbers = #tpu.dot_dimension_numbers<[2], [2], [1], [1], [0, 0, 0, 1, 1, 1], [0], [0]>} : vector<2x8x8xbf16>, vector<2x8x8xbf16>, vector<2x8x8xf32> -> vector<2x8x8xf32>
    %cst_5 = arith.constant 0xFF800000 : f32
    "tpu.trace_stop"() : () -> ()
    %15 = vector.shape_cast %7 : vector<8x8xi1> to vector<1x8x8xi1>
    %16 = vector.broadcast %15 : vector<1x8x8xi1> to vector<2x8x8xi1>
    %17 = vector.broadcast %cst_5 : f32 to vector<2x8x8xf32>
    %18 = arith.select %16, %14, %17 : vector<2x8x8xi1>, vector<2x8x8xf32>
    %cst_6 = arith.constant dense<0xFF800000> : vector<2x8xf32>
    %19 = vector.multi_reduction <maximumf>, %18, %cst_6 [2] : vector<2x8x8xf32> to vector<2x8xf32>
    %20 = vector.shape_cast %19 : vector<2x8xf32> to vector<2x8x1xf32>
    %21 = vector.broadcast %20 : vector<2x8x1xf32> to vector<2x8x8xf32>
    %22 = arith.subf %18, %21 : vector<2x8x8xf32>
    %23 = math.exp %22 : vector<2x8x8xf32>
    %cst_7 = arith.constant dense<0.000000e+00> : vector<2x8xf32>
    %24 = vector.multi_reduction <add>, %23, %cst_7 [2] : vector<2x8x8xf32> to vector<2x8xf32>
    %25 = vector.shape_cast %24 : vector<2x8xf32> to vector<2x8x1xf32>
    %26 = tpu.reciprocal %25 {approx = true} : vector<2x8x1xf32> -> vector<2x8x1xf32>
    %27 = vector.broadcast %26 : vector<2x8x1xf32> to vector<2x8x8xf32>
    %28 = arith.mulf %23, %27 : vector<2x8x8xf32>
    %29 = arith.truncf %28 : vector<2x8x8xf32> to vector<2x8x8xbf16>
    "tpu.trace_start"() <{level = 10 : i32, message = "bts,bsd->btd"}> : () -> ()
    %cst_8 = arith.constant dense<0.000000e+00> : vector<2x8x8xf32>
    %30 = tpu.matmul %29, %13, %cst_8 {dimension_numbers = #tpu.dot_dimension_numbers<[2], [1], [1], [2], [0, 0, 0, 1, 1, 2], [0], [0]>} : vector<2x8x8xbf16>, vector<2x8x8xbf16>, vector<2x8x8xf32> -> vector<2x8x8xf32>
    "tpu.trace_stop"() : () -> ()
    %31 = arith.truncf %30 : vector<2x8x8xf32> to vector<2x8x8xbf16>
    %c0_9 = arith.constant 0 : index
    %c0_10 = arith.constant 0 : index
    %c0_11 = arith.constant 0 : index
    %32 = vector.load %arg6[%c0_9, %c0_10, %c0_11] : memref<2x8x32xbf16, #tpu.memory_space<vmem>>, vector<2x8x8xbf16>
    tpu.vector_store %arg6[%c0_9, %c0_10, %c0_11], %31 {strides = array<i32>} : memref<2x8x32xbf16, #tpu.memory_space<vmem>>, vector<2x8x8xbf16>,
    %33 = vector.extract_strided_slice %4 {offsets = [0, 0, 8], sizes = [2, 8, 8], strides = [1, 1, 1]} : vector<2x8x96xf32> to vector<2x8x8xf32>
    %34 = arith.truncf %33 : vector<2x8x8xf32> to vector<2x8x8xbf16>
    %35 = vector.extract_strided_slice %4 {offsets = [0, 0, 40], sizes = [2, 8, 8], strides = [1, 1, 1]} : vector<2x8x96xf32> to vector<2x8x8xf32>
    %36 = arith.truncf %35 : vector<2x8x8xf32> to vector<2x8x8xbf16>
    %37 = vector.extract_strided_slice %4 {offsets = [0, 0, 72], sizes = [2, 8, 8], strides = [1, 1, 1]} : vector<2x8x96xf32> to vector<2x8x8xf32>
    %38 = arith.truncf %37 : vector<2x8x8xf32> to vector<2x8x8xbf16>
    "tpu.trace_start"() <{level = 10 : i32, message = "btd,bsd->bts"}> : () -> ()
    %cst_12 = arith.constant dense<0.000000e+00> : vector<2x8x8xf32>
    %39 = tpu.matmul %34, %36, %cst_12 {dimension_numbers = #tpu.dot_dimension_numbers<[2], [2], [1], [1], [0, 0, 0, 1, 1, 1], [0], [0]>} : vector<2x8x8xbf16>, vector<2x8x8xbf16>, vector<2x8x8xf32> -> vector<2x8x8xf32>
    %cst_13 = arith.constant 0xFF800000 : f32
    "tpu.trace_stop"() : () -> ()
    %40 = vector.shape_cast %7 : vector<8x8xi1> to vector<1x8x8xi1>
    %41 = vector.broadcast %40 : vector<1x8x8xi1> to vector<2x8x8xi1>
    %42 = vector.broadcast %cst_13 : f32 to vector<2x8x8xf32>
    %43 = arith.select %41, %39, %42 : vector<2x8x8xi1>, vector<2x8x8xf32>
    %cst_14 = arith.constant dense<0xFF800000> : vector<2x8xf32>
    %44 = vector.multi_reduction <maximumf>, %43, %cst_14 [2] : vector<2x8x8xf32> to vector<2x8xf32>
    %45 = vector.shape_cast %44 : vector<2x8xf32> to vector<2x8x1xf32>
    %46 = vector.broadcast %45 : vector<2x8x1xf32> to vector<2x8x8xf32>
    %47 = arith.subf %43, %46 : vector<2x8x8xf32>
    %48 = math.exp %47 : vector<2x8x8xf32>
    %cst_15 = arith.constant dense<0.000000e+00> : vector<2x8xf32>
    %49 = vector.multi_reduction <add>, %48, %cst_15 [2] : vector<2x8x8xf32> to vector<2x8xf32>
    %50 = vector.shape_cast %49 : vector<2x8xf32> to vector<2x8x1xf32>
    %51 = tpu.reciprocal %50 {approx = true} : vector<2x8x1xf32> -> vector<2x8x1xf32>
    %52 = vector.broadcast %51 : vector<2x8x1xf32> to vector<2x8x8xf32>
    %53 = arith.mulf %48, %52 : vector<2x8x8xf32>
    %54 = arith.truncf %53 : vector<2x8x8xf32> to vector<2x8x8xbf16>
    "tpu.trace_start"() <{level = 10 : i32, message = "bts,bsd->btd"}> : () -> ()
    %cst_16 = arith.constant dense<0.000000e+00> : vector<2x8x8xf32>
    %55 = tpu.matmul %54, %38, %cst_16 {dimension_numbers = #tpu.dot_dimension_numbers<[2], [1], [1], [2], [0, 0, 0, 1, 1, 2], [0], [0]>} : vector<2x8x8xbf16>, vector<2x8x8xbf16>, vector<2x8x8xf32> -> vector<2x8x8xf32>
    "tpu.trace_stop"() : () -> ()
    %56 = arith.truncf %55 : vector<2x8x8xf32> to vector<2x8x8xbf16>
    %c0_17 = arith.constant 0 : index
    %c0_18 = arith.constant 0 : index
    %c8 = arith.constant 8 : index
    %57 = vector.load %arg6[%c0_17, %c0_18, %c8] : memref<2x8x32xbf16, #tpu.memory_space<vmem>>, vector<2x8x8xbf16>
    tpu.vector_store %arg6[%c0_17, %c0_18, %c8], %56 {strides = array<i32>} : memref<2x8x32xbf16, #tpu.memory_space<vmem>>, vector<2x8x8xbf16>,
    %58 = vector.extract_strided_slice %4 {offsets = [0, 0, 16], sizes = [2, 8, 8], strides = [1, 1, 1]} : vector<2x8x96xf32> to vector<2x8x8xf32>
    %59 = arith.truncf %58 : vector<2x8x8xf32> to vector<2x8x8xbf16>
    %60 = vector.extract_strided_slice %4 {offsets = [0, 0, 48], sizes = [2, 8, 8], strides = [1, 1, 1]} : vector<2x8x96xf32> to vector<2x8x8xf32>
    %61 = arith.truncf %60 : vector<2x8x8xf32> to vector<2x8x8xbf16>
    %62 = vector.extract_strided_slice %4 {offsets = [0, 0, 80], sizes = [2, 8, 8], strides = [1, 1, 1]} : vector<2x8x96xf32> to vector<2x8x8xf32>
    %63 = arith.truncf %62 : vector<2x8x8xf32> to vector<2x8x8xbf16>
    "tpu.trace_start"() <{level = 10 : i32, message = "btd,bsd->bts"}> : () -> ()
    %cst_19 = arith.constant dense<0.000000e+00> : vector<2x8x8xf32>
    %64 = tpu.matmul %59, %61, %cst_19 {dimension_numbers = #tpu.dot_dimension_numbers<[2], [2], [1], [1], [0, 0, 0, 1, 1, 1], [0], [0]>} : vector<2x8x8xbf16>, vector<2x8x8xbf16>, vector<2x8x8xf32> -> vector<2x8x8xf32>
    %cst_20 = arith.constant 0xFF800000 : f32
    "tpu.trace_stop"() : () -> ()
    %65 = vector.shape_cast %7 : vector<8x8xi1> to vector<1x8x8xi1>
    %66 = vector.broadcast %65 : vector<1x8x8xi1> to vector<2x8x8xi1>
    %67 = vector.broadcast %cst_20 : f32 to vector<2x8x8xf32>
    %68 = arith.select %66, %64, %67 : vector<2x8x8xi1>, vector<2x8x8xf32>
    %cst_21 = arith.constant dense<0xFF800000> : vector<2x8xf32>
    %69 = vector.multi_reduction <maximumf>, %68, %cst_21 [2] : vector<2x8x8xf32> to vector<2x8xf32>
    %70 = vector.shape_cast %69 : vector<2x8xf32> to vector<2x8x1xf32>
    %71 = vector.broadcast %70 : vector<2x8x1xf32> to vector<2x8x8xf32>
    %72 = arith.subf %68, %71 : vector<2x8x8xf32>
    %73 = math.exp %72 : vector<2x8x8xf32>
    %cst_22 = arith.constant dense<0.000000e+00> : vector<2x8xf32>
    %74 = vector.multi_reduction <add>, %73, %cst_22 [2] : vector<2x8x8xf32> to vector<2x8xf32>
    %75 = vector.shape_cast %74 : vector<2x8xf32> to vector<2x8x1xf32>
    %76 = tpu.reciprocal %75 {approx = true} : vector<2x8x1xf32> -> vector<2x8x1xf32>
    %77 = vector.broadcast %76 : vector<2x8x1xf32> to vector<2x8x8xf32>
    %78 = arith.mulf %73, %77 : vector<2x8x8xf32>
    %79 = arith.truncf %78 : vector<2x8x8xf32> to vector<2x8x8xbf16>
    "tpu.trace_start"() <{level = 10 : i32, message = "bts,bsd->btd"}> : () -> ()
    %cst_23 = arith.constant dense<0.000000e+00> : vector<2x8x8xf32>
    %80 = tpu.matmul %79, %63, %cst_23 {dimension_numbers = #tpu.dot_dimension_numbers<[2], [1], [1], [2], [0, 0, 0, 1, 1, 2], [0], [0]>} : vector<2x8x8xbf16>, vector<2x8x8xbf16>, vector<2x8x8xf32> -> vector<2x8x8xf32>
    "tpu.trace_stop"() : () -> ()
    %81 = arith.truncf %80 : vector<2x8x8xf32> to vector<2x8x8xbf16>
    %c0_24 = arith.constant 0 : index
    %c0_25 = arith.constant 0 : index
    %c16 = arith.constant 16 : index
    %82 = vector.load %arg6[%c0_24, %c0_25, %c16] : memref<2x8x32xbf16, #tpu.memory_space<vmem>>, vector<2x8x8xbf16>
    tpu.vector_store %arg6[%c0_24, %c0_25, %c16], %81 {strides = array<i32>} : memref<2x8x32xbf16, #tpu.memory_space<vmem>>, vector<2x8x8xbf16>,
    %83 = vector.extract_strided_slice %4 {offsets = [0, 0, 24], sizes = [2, 8, 8], strides = [1, 1, 1]} : vector<2x8x96xf32> to vector<2x8x8xf32>
    %84 = arith.truncf %83 : vector<2x8x8xf32> to vector<2x8x8xbf16>
    %85 = vector.extract_strided_slice %4 {offsets = [0, 0, 56], sizes = [2, 8, 8], strides = [1, 1, 1]} : vector<2x8x96xf32> to vector<2x8x8xf32>
    %86 = arith.truncf %85 : vector<2x8x8xf32> to vector<2x8x8xbf16>
    %87 = vector.extract_strided_slice %4 {offsets = [0, 0, 88], sizes = [2, 8, 8], strides = [1, 1, 1]} : vector<2x8x96xf32> to vector<2x8x8xf32>
    %88 = arith.truncf %87 : vector<2x8x8xf32> to vector<2x8x8xbf16>
    "tpu.trace_start"() <{level = 10 : i32, message = "btd,bsd->bts"}> : () -> ()
    %cst_26 = arith.constant dense<0.000000e+00> : vector<2x8x8xf32>
    %89 = tpu.matmul %84, %86, %cst_26 {dimension_numbers = #tpu.dot_dimension_numbers<[2], [2], [1], [1], [0, 0, 0, 1, 1, 1], [0], [0]>} : vector<2x8x8xbf16>, vector<2x8x8xbf16>, vector<2x8x8xf32> -> vector<2x8x8xf32>
    %cst_27 = arith.constant 0xFF800000 : f32
    "tpu.trace_stop"() : () -> ()
    %90 = vector.shape_cast %7 : vector<8x8xi1> to vector<1x8x8xi1>
    %91 = vector.broadcast %90 : vector<1x8x8xi1> to vector<2x8x8xi1>
    %92 = vector.broadcast %cst_27 : f32 to vector<2x8x8xf32>
    %93 = arith.select %91, %89, %92 : vector<2x8x8xi1>, vector<2x8x8xf32>
    %cst_28 = arith.constant dense<0xFF800000> : vector<2x8xf32>
    %94 = vector.multi_reduction <maximumf>, %93, %cst_28 [2] : vector<2x8x8xf32> to vector<2x8xf32>
    %95 = vector.shape_cast %94 : vector<2x8xf32> to vector<2x8x1xf32>
    %96 = vector.broadcast %95 : vector<2x8x1xf32> to vector<2x8x8xf32>
    %97 = arith.subf %93, %96 : vector<2x8x8xf32>
    %98 = math.exp %97 : vector<2x8x8xf32>
    %cst_29 = arith.constant dense<0.000000e+00> : vector<2x8xf32>
    %99 = vector.multi_reduction <add>, %98, %cst_29 [2] : vector<2x8x8xf32> to vector<2x8xf32>
    %100 = vector.shape_cast %99 : vector<2x8xf32> to vector<2x8x1xf32>
    %101 = tpu.reciprocal %100 {approx = true} : vector<2x8x1xf32> -> vector<2x8x1xf32>
    %102 = vector.broadcast %101 : vector<2x8x1xf32> to vector<2x8x8xf32>
    %103 = arith.mulf %98, %102 : vector<2x8x8xf32>
    %104 = arith.truncf %103 : vector<2x8x8xf32> to vector<2x8x8xbf16>
    "tpu.trace_start"() <{level = 10 : i32, message = "bts,bsd->btd"}> : () -> ()
    %cst_30 = arith.constant dense<0.000000e+00> : vector<2x8x8xf32>
    %105 = tpu.matmul %104, %88, %cst_30 {dimension_numbers = #tpu.dot_dimension_numbers<[2], [1], [1], [2], [0, 0, 0, 1, 1, 2], [0], [0]>} : vector<2x8x8xbf16>, vector<2x8x8xbf16>, vector<2x8x8xf32> -> vector<2x8x8xf32>
    "tpu.trace_stop"() : () -> ()
    %106 = arith.truncf %105 : vector<2x8x8xf32> to vector<2x8x8xbf16>
    %c0_31 = arith.constant 0 : index
    %c0_32 = arith.constant 0 : index
    %c24 = arith.constant 24 : index
    %107 = vector.load %arg6[%c0_31, %c0_32, %c24] : memref<2x8x32xbf16, #tpu.memory_space<vmem>>, vector<2x8x8xbf16>
    tpu.vector_store %arg6[%c0_31, %c0_32, %c24], %106 {strides = array<i32>} : memref<2x8x32xbf16, #tpu.memory_space<vmem>>, vector<2x8x8xbf16>,
    %c0_33 = arith.constant 0 : index
    %c0_34 = arith.constant 0 : index
    %c0_35 = arith.constant 0 : index
    %108 = vector.load %arg6[%c0_33, %c0_34, %c0_35] : memref<2x8x32xbf16, #tpu.memory_space<vmem>>, vector<2x8x32xbf16>
    %109 = vector.shape_cast %108 : vector<2x8x32xbf16> to vector<16x32xbf16>
    %c0_36 = arith.constant 0 : index
    %c0_37 = arith.constant 0 : index
    %110 = vector.load %arg3[%c0_36, %c0_37] : memref<32x32xbf16, #tpu.memory_space<vmem>>, vector<32x32xbf16>
    %cst_38 = arith.constant dense<0.000000e+00> : vector<16x32xf32>
    %111 = tpu.matmul %109, %110, %cst_38 {dimension_numbers = #tpu.dot_dimension_numbers<[1], [0], [0], [1], [0, 0, 1, 1], [], []>} : vector<16x32xbf16>, vector<32x32xbf16>, vector<16x32xf32> -> vector<16x32xf32>
    %c0_39 = arith.constant 0 : index
    %c0_40 = arith.constant 0 : index
    %112 = vector.load %arg4[%c0_39, %c0_40] : memref<1x32xf32, #tpu.memory_space<vmem>>, vector<1x32xf32>
    %113 = vector.broadcast %112 : vector<1x32xf32> to vector<16x32xf32>
    %114 = arith.addf %111, %113 : vector<16x32xf32>
    %115 = vector.shape_cast %114 : vector<16x32xf32> to vector<2x8x32xf32>
    %c0_41 = arith.constant 0 : index
    %c0_42 = arith.constant 0 : index
    %c0_43 = arith.constant 0 : index
    %116 = vector.load %arg5[%c0_41, %c0_42, %c0_43] : memref<2x8x32xf32, #tpu.memory_space<vmem>>, vector<2x8x32xf32>
    tpu.vector_store %arg5[%c0_41, %c0_42, %c0_43], %115 {strides = array<i32>} : memref<2x8x32xf32, #tpu.memory_space<vmem>>, vector<2x8x32xf32>,
    return
  }
  func.func @transform_0(%arg0: i32) -> (i32, i32, i32) {
    %c0_i32 = arith.constant 0 : i32
    %c0_i32_0 = arith.constant 0 : i32
    %c0_i32_1 = arith.constant 0 : i32
    return %arg0, %c0_i32, %c0_i32_0 : i32, i32, i32
  }
  func.func @transform_1(%arg0: i32) -> (i32, i32) {
    %c0_i32 = arith.constant 0 : i32
    %c0_i32_0 = arith.constant 0 : i32
    %c0_i32_1 = arith.constant 0 : i32
    return %c0_i32, %c0_i32_0 : i32, i32
  }
  func.func @transform_2(%arg0: i32) -> (i32, i32) {
    %c0_i32 = arith.constant 0 : i32
    %c0_i32_0 = arith.constant 0 : i32
    %c0_i32_1 = arith.constant 0 : i32
    return %c0_i32, %c0_i32_0 : i32, i32
  }
  func.func @transform_3(%arg0: i32) -> (i32, i32) {
    %c0_i32 = arith.constant 0 : i32
    %c0_i32_0 = arith.constant 0 : i32
    %c0_i32_1 = arith.constant 0 : i32
    return %c0_i32, %c0_i32_0 : i32, i32
  }
  func.func @transform_4(%arg0: i32) -> (i32, i32, i32) {
    %c0_i32 = arith.constant 0 : i32
    %c0_i32_0 = arith.constant 0 : i32
    %c0_i32_1 = arith.constant 0 : i32
    return %arg0, %c0_i32, %c0_i32_0 : i32, i32, i32
  }
}

</mosaic_0001>

<bundles_post_ra>
// kernel: multihead_forward.1
= control target key start
LH: loop header
LB: loop body
LE: loop exit
PB: predicated region body
PF: predicated region fallthrough
CT: control target
= control target key end

     0   :  { %s947_s0 = inlined_call_operand.vmem [shape: bf16[2,8,32], index: 0, kind: input, shape index: {}]   ;;  %s948_s1 = inlined_call_operand.vmem [shape: bf16[32,96], index: 1, kind: input, shape index: {}]   ;;  %s949_s2 = inlined_call_operand.vmem [shape: bf16[32,32], index: 2, kind: input, shape index: {}]   ;;  %s950_s3 = inlined_call_operand.vmem [shape: f32[1,32], index: 3, kind: input, shape index: {}]   ;;  %s951_s4 = inlined_call_operand.hbm [shape: f32[2,8,32], index: 4, kind: output, shape index: {}]  }
   0x1   :  { %v681_v0 = vld [vmem:[%s948_s1 + $0x8] sm:$0xff] }
   0x2   :  { %9 = vsyncpa [#allocation4], 0  ;;  %52 = vmatpush.bf16.msra.mxu0 %v681_v0  ;;  %v680_v1 = vld [vmem:[%s948_s1] sm:$0xff]  ;;  %vm42_vm0 = vcmask 261120   ;;  %s760_s21 = smov 120   ;;  %s761_s22 = smov 88   ;;  %v60_v33 = vlaneseq }
   0x3   :  { %v679_v2 = vld [vmem:[%s947_s0] sm:$0xff]  ;;  %s762_s1 = smov 96   ;;  %s763_s0 = smov 112   ;;  %vm72_vm1 = vcmask 64512   ;;  %vm149_vm3 = vcmask 1043456   ;;  %vm189_vm4 = vcmask 60416  }
   0x4   :  { %s764_s23 = smov 80   ;;  %s765_s24 = smov 72   ;;  %v61_v34 = vshrl.u32 %v60_v33, 7  ;;  %v63_v35 = vand.u32 127, %v60_v33  ;;  %vm316_vm5 = vcmask 126016   ;;  %vm443_vm6 = vcmask 191616  }
   0x5   :  { %s766_s25 = smov 104   ;;  %s767_s26 = smov 64   ;;  %vm570_vm7 = vcmask 257216  }
   0x6   :  { %53 = vmatpush.bf16.msra.mxu0 %v680_v1  ;;  %vm845_vm2 = vcmp.ge.s32.totalorder %v61_v34, %v63_v35  ;;  %s768_s27 = smov 56   ;;  %s769_s28 = smov 48  }
   0x7   :  { %s770_s29 = smov 40   ;;  %s771_s30 = smov 8  }
   0x8   :  { %s772_s5 = smov 16   ;;  %s773_s6 = smov 24  }
   0x9   :  { %649 = vmatmul.msk.bf16.vlgmr.msra.gmra.mxu0 %vm42_vm0, %v679_v2  ;;  %s625_s16 = sshll.u32 %s951_s4, 4  ;;  %s775_s17 = smov 128   ;;  %s626_s16 = int_to_ptr.hbm [resolvable:$true] %s625_s16 }
  0x86   :  { %v55_v3 = vpop.f32.mrf.mxu0 }
  0x87   :  { %v65_v4 = vpack.c.bf16 %v55_v3, %v55_v3 }
  0x89   :  { %v68_v5 = vunpack.c.l.b16 %v65_v4 }
  0x8b   :  { %v811_v6 = vpack.c.b16 %v68_v5, %v68_v5 }
  0x8d   :  { %192 = vrot.lane.b32.xlu2 %v811_v6, %s760_s21  ;;  %194 = vrot.lane.b32.xlu1 %v811_v6, %s761_s22 }
  0x8e   :  { %70 = vrot.lane.b32.xlu0 %v811_v6, %s762_s1  ;;  %v57_v7 = vpop.f32.mrf.mxu0 }
  0x8f   :  { %v66_v8 = vpack.c.bf16 %v57_v7, %v57_v7 }
  0x91   :  { %v93_v9 = vunpack.c.l.b16 %v66_v8 }
  0x93   :  { %v816_v10 = vpack.c.b16 %v93_v9, %v93_v9 }
  0x95   :  { %215 = vrot.lane.b32.xlu2 %v816_v10, %s760_s21  ;;  %217 = vrot.lane.b32.xlu1 %v816_v10, %s761_s22 }
  0x96   :  { %95 = vrot.lane.b32.xlu0 %v816_v10, %s762_s1 }
  0x9d   :  { %319 = vrot.lane.b32.xlu2 %v811_v6, %s763_s0  ;;  %344 = vrot.lane.b32.xlu1 %v816_v10, %s764_s23 }
  0x9e   :  { %321 = vrot.lane.b32.xlu0 %v811_v6, %s764_s23 }
  0xa5   :  { %471 = vrot.lane.b32.xlu2 %v816_v10, %s765_s24  ;;  %448 = vrot.lane.b32.xlu1 %v811_v6, %s765_s24 }
  0xa6   :  { %342 = vrot.lane.b32.xlu0 %v816_v10, %s763_s0 }
  0xad   :  { %469 = vrot.lane.b32.xlu1 %v816_v10, %s766_s25 }
  0xae   :  { %446 = vrot.lane.b32.xlu0 %v811_v6, %s766_s25 }
  0xe7   :  { %v193_v11 = vpop.permute.xlu2 %192 }
  0xef   :  { %v216_v16 = vpop.permute.xlu2 %215 }
  0xf7   :  { %v320_v21 = vpop.permute.xlu2 %319 }
  0xff   :  { %v195_v12 = vpop.permute.xlu1 %194  ;;  %v472_v26 = vpop.permute.xlu2 %471 }
 0x100   :  { %v71_v13 = vpop.permute.xlu0 %70  ;;  %v200_v14 = vsel %vm72_vm1, %v195_v12, 0  ;;  %v477_v29 = vsel %vm72_vm1, %v472_v26, 0 }
 0x101   :  { %v77_v15 = vsel %vm72_vm1, %v71_v13, 0  ;;  %209 = vmatpush.bf16.xpose.msrb.mxu0 %v200_v14 }
 0x102   :  { %86 = vmatpush.bf16.xpose.msra.mxu1 %v77_v15 }
 0x107   :  { %v218_v17 = vpop.permute.xlu1 %217 }
 0x108   :  { %v96_v18 = vpop.permute.xlu0 %95  ;;  %654 = vmatmul.msk.bf16.vlgmr.msrb.gmra.mxu0 %vm72_vm1, %v193_v11  ;;  %v223_v19 = vsel %vm72_vm1, %v218_v17, 0 }
 0x109   :  { %650 = vmatmul.msk.bf16.vlgmr.msra.gmra.mxu1 %vm72_vm1, %v65_v4  ;;  %v101_v20 = vsel %vm72_vm1, %v96_v18, 0 }
 0x10a   :  { %110 = vmatpush.bf16.xpose.msra.mxu2 %v101_v20  ;;  %232 = vmatpush.bf16.xpose.msrb.mxu1 %v223_v19 }
 0x10f   :  { %v345_v22 = vpop.permute.xlu1 %344 }
 0x110   :  { %v350_v23 = vsel %vm72_vm1, %v345_v22, 0  ;;  %v322_v24 = vpop.permute.xlu0 %321 }
 0x111   :  { %v327_v25 = vsel %vm72_vm1, %v322_v24, 0  ;;  %651 = vmatmul.msk.bf16.vlgmr.msra.gmra.mxu2 %vm72_vm1, %v66_v8 }
 0x112   :  { %359 = vmatpush.bf16.xpose.msra.mxu1 %v350_v23  ;;  %336 = vmatpush.bf16.xpose.msra.mxu0 %v327_v25 }
 0x117   :  { %v449_v27 = vpop.permute.xlu1 %448 }
 0x118   :  { %v454_v28 = vsel %vm72_vm1, %v449_v27, 0  ;;  %v343_v30 = vpop.permute.xlu0 %342 }
 0x119   :  { %655 = vmatmul.msk.bf16.vlgmr.msrb.gmra.mxu1 %vm72_vm1, %v216_v16  ;;  %658 = vmatmul.msk.bf16.vlgmr.msra.gmra.mxu0 %vm72_vm1, %v320_v21 }
 0x11a   :  { %486 = vmatpush.bf16.xpose.msrb.mxu1 %v477_v29  ;;  %463 = vmatpush.bf16.xpose.msrb.mxu0 %v454_v28 }
 0x11f   :  { %v470_v32 = vpop.permute.xlu1 %469 }
 0x120   :  { %v447_v31 = vpop.permute.xlu0 %446 }
 0x129   :  { %659 = vmatmul.msk.bf16.vlgmr.msra.gmra.mxu1 %vm72_vm1, %v343_v30  ;;  %662 = vmatmul.msk.bf16.vlgmr.msrb.gmra.mxu0 %vm72_vm1, %v447_v31 }
 0x139   :  { %663 = vmatmul.msk.bf16.vlgmr.msrb.gmra.mxu1 %vm72_vm1, %v470_v32 }
 0x185   :  { %v211_v37 = vpop.f32.mrf.mxu0 }
 0x186   :  { %v88_v38 = vpop.f32.mrf.mxu1  ;;  %v238_v39 = vsel %vm845_vm2, %v211_v37, -inf }
 0x187   :  { %v118_v40 = vsel %vm845_vm2, %v88_v38, -inf  ;;  %v240_v41 = vsel %vm72_vm1, %v238_v39, -inf }
 0x188   :  { %v120_v42 = vsel %vm72_vm1, %v118_v40, -inf  ;;  %241 = vmax.xlane.f32.xlu1 %v240_v41 }
 0x189   :  { %121 = vmax.xlane.f32.xlu2 %v120_v42 }
 0x18d   :  { %v213_v43 = vpop.f32.mrf.mxu0 }
 0x18e   :  { %v90_v44 = vpop.f32.mrf.mxu1 }
 0x194   :  { %v112_v45 = vpop.f32.mrf.mxu2 }
 0x195   :  { %v119_v46 = vsel %vm845_vm2, %v112_v45, -inf }
 0x196   :  { %v234_v47 = vpop.f32.mrf.mxu1  ;;  %v338_v48 = vpop.f32.mrf.mxu0  ;;  %v123_v49 = vsel %vm72_vm1, %v119_v46, -inf }
 0x197   :  { %v239_v50 = vsel %vm845_vm2, %v234_v47, -inf  ;;  %v862_v51 = vsel %vm845_vm2, %v338_v48, -inf  ;;  %124 = vmax.xlane.f32.xlu0 %v123_v49 }
 0x198   :  { %v243_v52 = vsel %vm72_vm1, %v239_v50, -inf  ;;  %v367_v3 = vsel %vm72_vm1, %v862_v51, -inf }
 0x199   :  { %244 = vmax.xlane.f32.xlu2 %v243_v52 }
 0x19c   :  { %v114_v53 = vpop.f32.mrf.mxu2 }
 0x19e   :  { %v236_v54 = vpop.f32.mrf.mxu1  ;;  %v340_v55 = vpop.f32.mrf.mxu0 }
 0x1a1   :  { %166 = vrot.lane.b32.xlu1 %v816_v10, %s767_s26 }
 0x1a6   :  { %v361_v56 = vpop.f32.mrf.mxu1  ;;  %v465_v57 = vpop.f32.mrf.mxu0 }
 0x1a7   :  { %v366_v63 = vsel %vm845_vm2, %v361_v56, -inf  ;;  %v492_v2 = vsel %vm845_vm2, %v465_v57, -inf }
 0x1a8   :  { %v370_v1 = vsel %vm72_vm1, %v366_v63, -inf  ;;  %v494_v4 = vsel %vm72_vm1, %v492_v2, -inf }
 0x1a9   :  { %285 = vrot.lane.b32.xlu1 %v816_v10, %s768_s27 }
 0x1ab   :  { %264 = vrot.lane.b32.xlu0 %v811_v6, %s768_s27 }
 0x1ae   :  { %v363_v58 = vpop.f32.mrf.mxu1  ;;  %v467_v59 = vpop.f32.mrf.mxu0 }
 0x1b1   :  { %144 = vrot.lane.b32.xlu2 %v811_v6, %s767_s26 }
 0x1b6   :  { %v488_v60 = vpop.f32.mrf.mxu1 }
 0x1b7   :  { %v493_v62 = vsel %vm845_vm2, %v488_v60, -inf }
 0x1b8   :  { %v497_v0 = vsel %vm72_vm1, %v493_v62, -inf }
 0x1be   :  { %v490_v61 = vpop.f32.mrf.mxu1 }
 0x1d3   :  { %498 = vmax.xlane.f32.xlu1 %v497_v0 }
 0x1d5   :  { %371 = vmax.xlane.f32.xlu0 %v370_v1 }
 0x1da   :  { %368 = vmax.xlane.f32.xlu2 %v367_v3 }
 0x1dd   :  { %495 = vmax.xlane.f32.xlu0 %v494_v4 }
 0x1fb   :  { %v242_v5 = vpop.xlane.xlu1 %241 }
 0x1fc   :  { %v122_v7 = vpop.xlane.xlu2 %121  ;;  %v246_v8 = vsub.f32 %v238_v39, %v242_v5 }
 0x1fd   :  { %v126_v9 = vsub.f32 %v118_v40, %v122_v7 }
 0x1fe   :  { %v248_v11 = vmul.f32 1.442695, %v246_v8 }
 0x1ff   :  { %v128_v12 = vmul.f32 1.442695, %v126_v9 }
 0x200   :  { %702 = vpow2.f32 %v248_v11 }
 0x201   :  { %704 = vpow2.f32 %v128_v12 }
 0x206   :  { %v880_v13 = vpop.eup %702 }
 0x207   :  { %v882_v14 = vpop.eup %704  ;;  %v252_v15 = vsel %vm72_vm1, %v880_v13, 0.0 }
 0x208   :  { %v132_v16 = vsel %vm72_vm1, %v882_v14, 0.0  ;;  %253 = vadd.xlane.f32.xlu0 %v252_v15 }
 0x209   :  { %133 = vadd.xlane.f32.xlu1 %v132_v16 }
 0x20a   :  { %v125_v17 = vpop.xlane.xlu0 %124 }
 0x20b   :  { %v127_v18 = vsub.f32 %v119_v46, %v125_v17 }
 0x20c   :  { %v245_v19 = vpop.xlane.xlu2 %244 }
 0x20d   :  { %v130_v20 = vmul.f32 1.442695, %v127_v18  ;;  %v247_v21 = vsub.f32 %v239_v50, %v245_v19 }
 0x20f   :  { %706 = vpow2.f32 %v130_v20  ;;  %v250_v22 = vmul.f32 1.442695, %v247_v21 }
 0x211   :  { %708 = vpow2.f32 %v250_v22 }
 0x213   :  { %v167_v23 = vpop.permute.xlu1 %166 }
 0x214   :  { %v145_v24 = vpop.permute.xlu2 %144  ;;  %v172_v25 = vsel %vm149_vm3, %v167_v23, 0 }
 0x215   :  { %v889_v26 = vpop.eup %706  ;;  %v151_v27 = vsel %vm149_vm3, %v145_v24, 0 }
 0x216   :  { %160 = vmatpush.bf16.msra.mxu3 %v151_v27  ;;  %v135_v28 = vsel %vm72_vm1, %v889_v26, 0.0 }
 0x217   :  { %v894_v29 = vpop.eup %708  ;;  %136 = vadd.xlane.f32.xlu0 %v135_v28 }
 0x218   :  { %v255_v30 = vsel %vm72_vm1, %v894_v29, 0.0 }
 0x219   :  { %256 = vadd.xlane.f32.xlu2 %v255_v30 }
 0x21a   :  { %181 = vmatpush.bf16.msrb.mxu3 %v172_v25 }
 0x21b   :  { %v286_v33 = vpop.permute.xlu1 %285 }
 0x21d   :  { %v265_v31 = vpop.permute.xlu0 %264 }
 0x21e   :  { %v270_v32 = vsel %vm149_vm3, %v265_v31, 0 }
 0x21f   :  { %279 = vmatpush.bf16.msrb.mxu2 %v270_v32 }
 0x222   :  { %412 = vrot.lane.b32.xlu1 %v816_v10, %s769_s28 }
 0x231   :  { %391 = vrot.lane.b32.xlu2 %v811_v6, %s769_s28 }
 0x246   :  { %v499_v34 = vpop.xlane.xlu1 %498 }
 0x247   :  { %v501_v35 = vsub.f32 %v493_v62, %v499_v34  ;;  %v291_v62 = vsel %vm149_vm3, %v286_v33, 0 }
 0x248   :  { %v372_v36 = vpop.xlane.xlu0 %371 }
 0x249   :  { %v374_v37 = vsub.f32 %v366_v63, %v372_v36  ;;  %v504_v39 = vmul.f32 1.442695, %v501_v35 }
 0x24b   :  { %v377_v38 = vmul.f32 1.442695, %v374_v37 }
 0x24d   :  { %710 = vpow2.f32 %v377_v38  ;;  %v369_v40 = vpop.xlane.xlu2 %368 }
 0x24e   :  { %v373_v41 = vsub.f32 %v862_v51, %v369_v40  ;;  %712 = vpow2.f32 %v504_v39 }
 0x250   :  { %v375_v42 = vmul.f32 1.442695, %v373_v41  ;;  %v496_v43 = vpop.xlane.xlu0 %495 }
 0x251   :  { %v500_v44 = vsub.f32 %v492_v2, %v496_v43 }
 0x252   :  { %714 = vpow2.f32 %v375_v42 }
 0x253   :  { %v711_v45 = vpop.eup %710  ;;  %v502_v46 = vmul.f32 1.442695, %v500_v44 }
 0x254   :  { %v382_v47 = vsel %vm72_vm1, %v711_v45, 0.0  ;;  %v903_v48 = vpop.eup %712 }
 0x255   :  { %716 = vpow2.f32 %v502_v46  ;;  %383 = vadd.xlane.f32.xlu0 %v382_v47  ;;  %v509_v52 = vsel %vm72_vm1, %v903_v48, 0.0 }
 0x258   :  { %v715_v49 = vpop.eup %714 }
 0x259   :  { %v379_v50 = vsel %vm72_vm1, %v715_v49, 0.0 }
 0x25a   :  { %380 = vadd.xlane.f32.xlu1 %v379_v50  ;;  %510 = vadd.xlane.f32.xlu2 %v509_v52 }
 0x25b   :  { %v717_v51 = vpop.eup %716 }
 0x25c   :  { %v506_v53 = vsel %vm72_vm1, %v717_v51, 0.0 }
 0x25d   :  { %507 = vadd.xlane.f32.xlu0 %v506_v53 }
 0x271   :  { %518 = vrot.lane.b32.xlu0 %v811_v6, %s770_s29 }
 0x273   :  { %539 = vrot.lane.b32.xlu1 %v816_v10, %s770_s29 }
 0x27b   :  { %v254_v54 = vpop.xlane.xlu0 %253 }
 0x27c   :  { %v134_v55 = vpop.xlane.xlu1 %133  ;;  %718 = vrcp.f32 %v254_v54 }
 0x27d   :  { %720 = vrcp.f32 %v134_v55 }
 0x282   :  { %v719_v56 = vpop.eup %718 }
 0x283   :  { %v721_v57 = vpop.eup %720  ;;  %v260_v58 = vmul.f32 %v719_v56, %v880_v13 }
 0x284   :  { %v140_v59 = vmul.f32 %v721_v57, %v882_v14  ;;  %v684_v57 = vld [vmem:[%s949_s2 + $0x8] sm:$0xff] }
 0x285   :  { %v262_v60 = vpack.c.bf16 %v260_v58, %v260_v58  ;;  %609 = vmatpush.bf16.msra.mxu0 %v684_v57  ;;  %v683_v58 = vld [vmem:[%s949_s2] sm:$0xff]  ;;  %s774_s2 = smov [#allocation3]  }
 0x286   :  { %v142_v61 = vpack.c.bf16 %v140_v59, %v140_v59  ;;  %s623_s13 = sshll.u32 %s774_s2, 4  ;;  %s624_s13 = int_to_ptr.vmem [resolvable:$true] %s623_s13 }
 0x287   :  { %656 = vmatmul.msk.bf16.vlgmr.msrb.gmra.mxu2 %vm72_vm1, %v262_v60 }
 0x288   :  { %652 = vmatmul.msk.bf16.vlgmr.msra.gmra.mxu3 %vm72_vm1, %v142_v61 }
 0x289   :  { %300 = vmatpush.bf16.msra.mxu3 %v291_v62  ;;  %610 = vmatpush.bf16.msra.mxu0 %v683_v58 }
 0x28a   :  { %v137_v6 = vpop.xlane.xlu0 %136 }
 0x28b   :  { %722 = vrcp.f32 %v137_v6 }
 0x28c   :  { %v257_v10 = vpop.xlane.xlu2 %256 }
 0x28d   :  { %724 = vrcp.f32 %v257_v10  ;;  %v701_v10 = vld [vmem:[%s950_s3] ss:$0 sm:$0xff] }
 0x291   :  { %v723_v63 = vpop.eup %722 }
 0x292   :  { %v141_v0 = vmul.f32 %v723_v63, %v889_v26 }
 0x293   :  { %v725_v7 = vpop.eup %724 }
 0x294   :  { %v392_v1 = vpop.permute.xlu2 %391  ;;  %v413_v3 = vpop.permute.xlu1 %412  ;;  %v143_v4 = vpack.c.bf16 %v141_v0, %v141_v0  ;;  %v261_v8 = vmul.f32 %v725_v7, %v894_v29 }
 0x295   :  { %v397_v2 = vsel %vm149_vm3, %v392_v1, 0  ;;  %v418_v5 = vsel %vm149_vm3, %v413_v3, 0 }
 0x296   :  { %406 = vmatpush.bf16.msra.mxu2 %v397_v2  ;;  %v263_v9 = vpack.c.bf16 %v261_v8, %v261_v8 }
 0x298   :  { %653 = vmatmul.msk.bf16.vlgmr.msrb.gmra.mxu3 %vm72_vm1, %v143_v4 }
 0x299   :  { %427 = vmatpush.bf16.msrb.mxu3 %v418_v5 }
 0x2a8   :  { %657 = vmatmul.msk.bf16.vlgmr.msra.gmra.mxu3 %vm72_vm1, %v263_v9 }
 0x2c8   :  { %v384_v11 = vpop.xlane.xlu0 %383 }
 0x2c9   :  { %726 = vrcp.f32 %v384_v11 }
 0x2cd   :  { %v381_v12 = vpop.xlane.xlu1 %380  ;;  %v511_v18 = vpop.xlane.xlu2 %510 }
 0x2ce   :  { %728 = vrcp.f32 %v381_v12 }
 0x2cf   :  { %v727_v13 = vpop.eup %726  ;;  %730 = vrcp.f32 %v511_v18 }
 0x2d0   :  { %v388_v14 = vmul.f32 %v727_v13, %v711_v45  ;;  %v508_v20 = vpop.xlane.xlu0 %507 }
 0x2d1   :  { %732 = vrcp.f32 %v508_v20 }
 0x2d2   :  { %v390_v15 = vpack.c.bf16 %v388_v14, %v388_v14 }
 0x2d4   :  { %661 = vmatmul.msk.bf16.vlgmr.msrb.gmra.mxu3 %vm72_vm1, %v390_v15  ;;  %v729_v16 = vpop.eup %728 }
 0x2d5   :  { %v387_v17 = vmul.f32 %v729_v16, %v715_v49  ;;  %v731_v21 = vpop.eup %730 }
 0x2d6   :  { %v515_v24 = vmul.f32 %v731_v21, %v903_v48 }
 0x2d7   :  { %v389_v19 = vpack.c.bf16 %v387_v17, %v387_v17  ;;  %v733_v22 = vpop.eup %732 }
 0x2d8   :  { %v514_v25 = vmul.f32 %v733_v22, %v717_v51  ;;  %v517_v29 = vpack.c.bf16 %v515_v24, %v515_v24 }
 0x2d9   :  { %660 = vmatmul.msk.bf16.vlgmr.msra.gmra.mxu2 %vm72_vm1, %v389_v19 }
 0x2da   :  { %v516_v30 = vpack.c.bf16 %v514_v25, %v514_v25 }
 0x2e3   :  { %v519_v23 = vpop.permute.xlu0 %518 }
 0x2e4   :  { %v524_v26 = vsel %vm149_vm3, %v519_v23, 0 }
 0x2e5   :  { %v540_v27 = vpop.permute.xlu1 %539  ;;  %533 = vmatpush.bf16.msrb.mxu2 %v524_v26 }
 0x2e6   :  { %v545_v28 = vsel %vm149_vm3, %v540_v27, 0 }
 0x2e7   :  { %554 = vmatpush.bf16.msra.mxu3 %v545_v28 }
 0x2e9   :  { %664 = vmatmul.msk.bf16.vlgmr.msrb.gmra.mxu2 %vm72_vm1, %v516_v30 }
 0x2ea   :  { %665 = vmatmul.msk.bf16.vlgmr.msra.gmra.mxu3 %vm72_vm1, %v517_v29 }
 0x30a   :  { %v281_v31 = vpop.f32.mrf.mxu2 }
 0x30b   :  { %v162_v32 = vpop.f32.mrf.mxu3  ;;  %v306_v33 = vpack.c.bf16 %v281_v31, %v281_v31 }
 0x30c   :  { %v187_v34 = vpack.c.bf16 %v162_v32, %v162_v32 }
 0x30d   :  { %310 = vrot.lane.b32.xlu0 %v306_v33, %s771_s30 }
 0x30e   :  { %190 = vst.msk [vmem:[#allocation2] sm:$0xf] %vm189_vm4, %v187_v34 }
 0x312   :  { %v283_v35 = vpop.f32.mrf.mxu2 }
 0x313   :  { %v164_v36 = vpop.f32.mrf.mxu3 }
 0x31b   :  { %v183_v37 = vpop.f32.mrf.mxu3 }
 0x31c   :  { %v188_v38 = vpack.c.bf16 %v183_v37, %v183_v37 }
 0x31e   :  { %191 = vst.msk [vmem:[#allocation2 + $0x4] sm:$0xf] %vm189_vm4, %v188_v38 }
 0x323   :  { %v185_v39 = vpop.f32.mrf.mxu3 }
 0x32b   :  { %v302_v40 = vpop.f32.mrf.mxu3 }
 0x32c   :  { %v307_v41 = vpack.c.bf16 %v302_v40, %v302_v40 }
 0x32e   :  { %312 = vrot.lane.b32.xlu1 %v307_v41, %s771_s30 }
 0x333   :  { %v304_v42 = vpop.f32.mrf.mxu3 }
 0x357   :  { %v429_v43 = vpop.f32.mrf.mxu3 }
 0x358   :  { %v434_v44 = vpack.c.bf16 %v429_v43, %v429_v43 }
 0x35a   :  { %439 = vrot.lane.b32.xlu1 %v434_v44, %s772_s5 }
 0x35c   :  { %v408_v45 = vpop.f32.mrf.mxu2 }
 0x35d   :  { %v433_v46 = vpack.c.bf16 %v408_v45, %v408_v45 }
 0x35f   :  { %v431_v47 = vpop.f32.mrf.mxu3  ;;  %437 = vrot.lane.b32.xlu0 %v433_v46, %s772_s5 }
 0x364   :  { %v410_v48 = vpop.f32.mrf.mxu2 }
 0x36c   :  { %v535_v49 = vpop.f32.mrf.mxu2 }
 0x36d   :  { %v556_v50 = vpop.f32.mrf.mxu3  ;;  %v560_v52 = vpack.c.bf16 %v535_v49, %v535_v49 }
 0x36e   :  { %v561_v51 = vpack.c.bf16 %v556_v50, %v556_v50 }
 0x36f   :  { %564 = vrot.lane.b32.xlu2 %v560_v52, %s773_s6 }
 0x370   :  { %566 = vrot.lane.b32.xlu0 %v561_v51, %s773_s6 }
 0x374   :  { %v537_v53 = vpop.f32.mrf.mxu2 }
 0x375   :  { %v558_v54 = vpop.f32.mrf.mxu3 }
 0x37f   :  { %v311_v55 = vpop.permute.xlu0 %310 }
 0x380   :  { %317 = vst.msk [vmem:[#allocation2] sm:$0xf] %vm316_vm5, %v311_v55 }
 0x3a0   :  { %v313_v56 = vpop.permute.xlu1 %312 }
 0x3a1   :  { %318 = vst.msk [vmem:[#allocation2 + $0x4] sm:$0xf] %vm316_vm5, %v313_v56 }
 0x3c9   :  { %v565_v61 = vpop.permute.xlu2 %564 }
 0x3cc   :  { %v440_v59 = vpop.permute.xlu1 %439 }
 0x3cd   :  { %445 = vst.msk [vmem:[#allocation2 + $0x4] sm:$0xf] %vm443_vm6, %v440_v59 }
 0x3d1   :  { %v438_v60 = vpop.permute.xlu0 %437 }
 0x3d2   :  { %444 = vst.msk [vmem:[#allocation2] sm:$0xf] %vm443_vm6, %v438_v60 }
 0x3d3   :  { %571 = vst.msk [vmem:[#allocation2] sm:$0xf] %vm570_vm7, %v565_v61 }
 0x3e2   :  { %v567_v62 = vpop.permute.xlu0 %566 }
 0x3e3   :  { %572 = vst.msk [vmem:[#allocation2 + $0x4] sm:$0xf] %vm570_vm7, %v567_v62 }
 0x3ea   :  { %v682_v6 = vld [vmem:[#allocation2] sm:$0xff] }
 0x3eb   :  { %678 = vmatmul.msk.bf16.vlgmr.msra.gmra.mxu0 %vm42_vm0, %v682_v6 }
 0x468   :  { %v612_v63 = vpop.f32.mrf.mxu0 }
 0x469   :  { %v613_v0 = vadd.f32 %v701_v10, %v612_v63 }
 0x46b   :  { %617 = vst.msk [vmem:[#allocation3] sm:$0xff] %vm42_vm0, %v613_v0 }
 0x470   :  { %v614_v1 = vpop.f32.mrf.mxu0 }
 0x471   :  { %v615_v2 = vadd.f32 %v701_v10, %v614_v1 }
 0x473   :  { %618 = vst.msk [vmem:[#allocation3 + $0x8] sm:$0xff] %vm42_vm0, %v615_v2 }
 0x474   :  { %631 = dma.vmem_to_hbm [thread:$0]  %s624_s13, 256, %s626_s16, [#allocation4], %s775_s17, %s775_s17, %s771_s30  }
 0x475   :  { %758 = dma.done.wait [#allocation4], 256  }
 0x476   :  { %759 = vsyncadd [#allocation4], 4294967040 }
 0x477   :  { %636 = vsyncpa [#allocation4], 1 }

</bundles_post_ra>
